<compile_context>
chip_gen: v6e
topology: v6e:2x2x1
jax: 0.10.0
libtpu: 0.0.40
codegen_flags: <defaults>
</compile_context>

<pallas_src>
import numpy as np

import jax
import jax.numpy as jnp
from jax import lax
from jax.experimental import pallas as pl
from jax.experimental.pallas import tpu as pltpu


def _round_up(x: int, m: int) -> int:
    return ((x + m - 1) // m) * m


# ---------------------------------------------------------------------------
# Kernel
# ---------------------------------------------------------------------------
def _pos_embed3d_kernel(coords_ref, table_ref, out_ref):
    """coords_ref: (TN, 8) f32  -- columns [x, y, z, 1, 0, 0, 0, 0]
       table_ref : (8, D)  f32  -- rows [scale_x, scale_y, scale_z, phase, 0..]
       out_ref   : (TN, D)      -- sin(angle) where angle = coords8 @ table"""
    # Full-f32 MXU matmul (precision=HIGHEST): angles can be O(10-1000) rad,
    # so a default (bf16-pass) dot would destroy accuracy before the sin.
    angle = jnp.dot(
        coords_ref[...], table_ref[...],
        preferred_element_type=jnp.float32,
        precision=lax.Precision.HIGHEST,
    )
    # cos(a) == sin(a + pi/2): the phase row already added pi/2 to the cos
    # columns, so a single transcendental pass covers both.
    out_ref[...] = jnp.sin(angle).astype(out_ref.dtype)


# ---------------------------------------------------------------------------
# Host-side column table: angle[:, j] = coords8 @ table[:, j]
# ---------------------------------------------------------------------------
def _angle_table(embedding_dim: int) -> jax.Array:
    d = embedding_dim
    third = d // 3
    j = np.arange(d)
    axis = j // third                      # which coordinate feeds column j
    within = j % third
    even_dim = within - (within % 2)       # the "dim" of the sin/cos pair
    inv_freq = np.power(10000.0, -(even_dim.astype(np.float64)) / d)   # (D,)

    table = np.zeros((8, d), np.float64)
    for t in range(3):                     # rows 0..2: masked inverse freqs
        table[t] = np.where(axis == t, inv_freq, 0.0)
    table[3] = np.where(within % 2 == 1, np.pi / 2.0, 0.0)   # row 3: phase
    # rows 4..7 stay zero (K padded to a full sublane tile of 8)
    return jnp.asarray(table, jnp.float32)


# ---------------------------------------------------------------------------
# VMEM footprint model (review fix: count lane padding + matmul temporary)
# ---------------------------------------------------------------------------
_VMEM_BUDGET = 12 * 1024 * 1024   # stays under every chip's default scoped VMEM


def _vmem_bytes(tile_n: int, d: int) -> int:
    out_blk = tile_n * d * 4                      # double-buffered output
    coords_blk = tile_n * 128 * 4                 # (tile_n, 8) lane-padded to 128
    angle_tmp = tile_n * d * 4                    # f32 dot result before sin
    table = 8 * _round_up(d, 128) * 4
    return 2 * out_blk + 2 * coords_blk + angle_tmp + table


# ---------------------------------------------------------------------------
# Wrapper
# ---------------------------------------------------------------------------
def positional_embed_3d(coords: jax.Array, embedding_dim: int, *,
                        tile_n: int = 1024, out_dtype=jnp.float32):
    if embedding_dim % 6 != 0:
        raise ValueError('Embedding dimension must be divisible by 6.')
    d = embedding_dim
    n = coords.shape[0]

    coords = coords.astype(jnp.float32)
    # coords8 = [x, y, z, 1, 0, 0, 0, 0]; the ones column picks up the phase row.
    coords8 = jnp.concatenate(
        [coords,
         jnp.ones((n, 1), jnp.float32),
         jnp.zeros((n, 4), jnp.float32)], axis=1)

    # Only pad for the tiny N < 8 case (sublane-tile minimum); everything else
    # relies on Pallas masking the ragged last block.
    n_eff = max(n, 8)
    if n_eff != n:
        coords8 = jnp.pad(coords8, ((0, n_eff - n), (0, 0)))

    table = _angle_table(d)

    # Row tile: big enough to amortize the ~0.35 us per-grid-step overhead,
    # a multiple of 8, capped so the grid has >= 2 steps (v7x megacore), and
    # shrunk until the double-buffered working set fits the VMEM budget.
    tn = min(tile_n, _round_up(pl.cdiv(n_eff, 2), 8)) if n_eff > 8 else 8
    tn = max(8, _round_up(min(tn, n_eff), 8))
    while tn > 8 and _vmem_bytes(tn, d) > _VMEM_BUDGET:
        tn = max(8, _round_up(tn // 2, 8))

    grid = (pl.cdiv(n_eff, tn),)

    out = pl.pallas_call(
        _pos_embed3d_kernel,
        out_shape=jax.ShapeDtypeStruct((n_eff, d), out_dtype),
        grid=grid,
        in_specs=[
            pl.BlockSpec((tn, 8), lambda i: (i, 0)),   # per-tile coords (K=8)
            pl.BlockSpec((8, d), lambda i: (0, 0)),    # constant angle table
        ],
        out_specs=pl.BlockSpec((tn, d), lambda i: (i, 0)),
        compiler_params=pltpu.CompilerParams(
            dimension_semantics=("parallel",)),
    )(coords8, table)

    return out[:n] if n_eff != n else out


# ---------------------------------------------------------------------------
# Pure-JAX reference (mirrors the PyTorch loop, vectorized)
# ---------------------------------------------------------------------------
def _reference(coords, embedding_dim):
    d = embedding_dim
    third = d // 3
    dims = np.arange(0, third, 2)
    freq = np.power(10000.0, dims / d)                       # (third//2,)
    args = coords.astype(jnp.float32)[:, :, None] / freq[None, None, :]
    pair = jnp.stack([jnp.sin(args), jnp.cos(args)], axis=-1)  # (N,3,third//2,2)
    return pair.reshape(coords.shape[0], d)


if __name__ == "__main__":
    key = jax.random.PRNGKey(0)
    # (awkward ragged N, small lane-masked D), (lane-dense D), (large |coords|)
    configs = ((37, 48, 3.0, 3e-5), (64, 384, 3.0, 3e-5), (128, 96, 100.0, 2e-3))
    for n, d, scale, atol in configs:
        key, sub = jax.random.split(key)
        coords = jax.random.normal(sub, (n, 3), dtype=jnp.float32) * scale

        out = jax.block_until_ready(positional_embed_3d(coords, d))
        ref = _reference(coords, d)

        assert out.shape == (n, d), (out.shape, (n, d))
        assert out.dtype == jnp.float32
        err = float(jnp.max(jnp.abs(out - ref)))
        assert err <= atol, (n, d, scale, err)

    print("KERNEL_OK")
</pallas_src>

<mosaic_0001>
module attributes {stable_mosaic.version = 11 : i64} {
  func.func @_pos_embed3d_kernel(%arg0: i32, %arg1: memref<24x8xf32, #tpu.memory_space<vmem>>, %arg2: memref<8x48xf32, #tpu.memory_space<vmem>>, %arg3: memref<24x48xf32, #tpu.memory_space<vmem>>) attributes {dimension_semantics = [#tpu.dimension_semantics<parallel>], iteration_bounds = array<i64: 2>, scalar_prefetch = 0 : i64, scratch_operands = 0 : i64, tpu.core_type = #tpu.core_type<tc>, window_params = [{transform_indices = @transform_0, window_bounds = array<i64: 24, 8>}, {pipeline_mode = #tpu.pipeline_mode<synchronous>, transform_indices = @transform_1, window_bounds = array<i64: 8, 48>}, {transform_indices = @transform_2, window_bounds = array<i64: 24, 48>}]} {
    %c0 = arith.constant 0 : index
    %c0_0 = arith.constant 0 : index
    %0 = vector.load %arg1[%c0, %c0_0] : memref<24x8xf32, #tpu.memory_space<vmem>>, vector<24x8xf32>
    %c0_1 = arith.constant 0 : index
    %c0_2 = arith.constant 0 : index
    %1 = vector.load %arg2[%c0_1, %c0_2] : memref<8x48xf32, #tpu.memory_space<vmem>>, vector<8x48xf32>
    %cst = arith.constant dense<0.000000e+00> : vector<24x48xf32>
    %2 = tpu.matmul %0, %1, %cst {dimension_numbers = #tpu.dot_dimension_numbers<[1], [0], [0], [1], [0, 0, 1, 1], [], []>, precision = #tpu.contract_precision<fp32>} : vector<24x8xf32>, vector<8x48xf32>, vector<24x48xf32> -> vector<24x48xf32>
    %3 = math.sin %2 : vector<24x48xf32>
    %c0_3 = arith.constant 0 : index
    %c0_4 = arith.constant 0 : index
    %4 = vector.load %arg3[%c0_3, %c0_4] : memref<24x48xf32, #tpu.memory_space<vmem>>, vector<24x48xf32>
    tpu.vector_store %arg3[%c0_3, %c0_4], %3 {strides = array<i32>} : memref<24x48xf32, #tpu.memory_space<vmem>>, vector<24x48xf32>,
    return
  }
  func.func @transform_0(%arg0: i32) -> (i32, i32) {
    %c0_i32 = arith.constant 0 : i32
    %c0_i32_0 = arith.constant 0 : i32
    return %arg0, %c0_i32 : i32, i32
  }
  func.func @transform_1(%arg0: i32) -> (i32, i32) {
    %c0_i32 = arith.constant 0 : i32
    %c0_i32_0 = arith.constant 0 : i32
    %c0_i32_1 = arith.constant 0 : i32
    return %c0_i32, %c0_i32_0 : i32, i32
  }
  func.func @transform_2(%arg0: i32) -> (i32, i32) {
    %c0_i32 = arith.constant 0 : i32
    %c0_i32_0 = arith.constant 0 : i32
    return %arg0, %c0_i32 : i32, i32
  }
}

</mosaic_0001>

<bundles_post_ra>
// kernel: tpu_custom_call.1
= control target key start
LH: loop header
LB: loop body
LE: loop exit
PB: predicated region body
PF: predicated region fallthrough
CT: control target
= control target key end

     0   :  { %7 = vsyncpa [#allocation3], 0  ;;  %s1735_s0 = inlined_call_operand.vmem [shape: f32[37,8], index: 0, kind: input, shape index: {}]   ;;  %s1736_s1 = inlined_call_operand.vmem [shape: f32[8,48], index: 1, kind: input, shape index: {}]   ;;  %s1737_s2 = inlined_call_operand.hbm [shape: f32[37,48], index: 2, kind: output, shape index: {}]  }
   0x1   :  { %9 = vsyncpa [#allocation3 + $0x1], 0  ;;  %s1389_s9 = smov 0   ;;  %s1391_s10 = smov 0  }
   0x2   :  { %s1393_s11 = smov 0   ;;  %s1395_s12 = smov 0  }
   0x3 LB: > { %s1410_s13 = sadd.s32 4294967295, %s1361_s12   ;;  %s1113_s14 = sadd.s32 4294967294, %s1361_s12   ;;  %s1361_s12 = sphi %s1395_s12, %s1747_s12   ;;  %s1357_s11 = sphi %s1393_s11, %s1746_s11   ;;  %s1353_s10 = sphi %s1391_s10, %s1745_s10   ;;  %s1349_s9 = sphi %s1389_s9, %s1744_s9  }
   0x4   : > { %s1414_s15 = sadd.s32 1, %s1361_s12   ;;  %s69_s16 = sadd.s32 1, %s1357_s11 }
   0x5   : > { %s66_s17 = ssub.s32 %s1361_s12, %s1414_s15  ;;  %p79_p0 = scmp.ne.s32.totalorder %s1357_s11, %s1353_s10 }
   0x6   : > { %p67_p1 = scmp.eq.s32.totalorder %s66_s17, 0  ;;  %p80_p2 = scmp.eq.s32.totalorder %s1410_s13, 1 }
   0x7   : > { %p85_p3 = scmp.ne.s32.totalorder %s1353_s10, %s1349_s9  ;;  %p86_p4 = scmp.eq.s32.totalorder %s1113_s14, 1 }
   0x8   : > { %s1425_s18 = scalar_select %p67_p1, %s1357_s11, %s69_s16  }
   0x9   : > { %p1427_p5 = por %p80_p2, %p79_p0  ;;  %p1431_p6 = por %p86_p4, %p85_p3 }
   0xa   : > { %p1116_p7 = scmp.ge.s32.totalorder %s1361_s12, 1  ;;  %p124_p8 = scmp.lt.s32.totalorder %s1361_s12, 3 }
   0xc   : > { %p125_p9 = pnand %p1116_p7, %p124_p8 }
   0xd   : > { %s1441_s23 = smul.u32 (!%p125_p9), 3, %s1410_s13  ;;  %s147_s29 = sand.u32 (!%p125_p9), 1, %s1353_s10  }
   0xe   : > { %128 = sbr.rel (%p125_p9) target bundleno = 395 (0x18b), region = 28  ;;  %s1675_s4 = scalar_lea.sflag (!%p125_p9), [#allocation3], %s147_s29 }
   0xf   : > { %p155_p10 = scmp.lt.s32.totalorder (!%p125_p9), %s1441_s23, 4  ;;  %s1228_s30 = smul.u32 (!%p125_p9), 24, %s147_s29 }
  0x11   : > { %s1657_s3 = scalar_lea.vmem (!%p125_p9), [#allocation2], %s1228_s30 }
  0x13   : > { %v172_v0 = vld [vmem:[%s1736_s1] sm:$0xff]  ;;  %v1363_v1 = vmov 0.0   ;;  %vm1364_vm0 = vmmov 0   ;;  %s156_s24 = scalar_select %p155_p10, %s1441_s23, 4  ;;  %vm173_vm1 = vcmask 64512  }
  0x14   : > { %1162 = vmatprep.subr.mxu0 %v1363_v1  ;;  %v214_v2 = vand.u32 4294901760, %v172_v0  ;;  %1173 = vmatprep.subr.mxu1 %v1363_v1  ;;  %s1040_s5 = ssub.s32 (%p1427_p5), 5, %s1441_s23 }
  0x15   : > { %1164 = vmatprep.mubr.msk.f32.mxu0 %vm1364_vm0, %v1363_v1  ;;  %1175 = vmatprep.mubr.msk.f32.mxu1 %vm1364_vm0, %v1363_v1  ;;  %s1117_s25 = sshll.u32 %s156_s24, 3  ;;  %p1041_p11 = scmp.lt.s32.totalorder (%p1427_p5), %s1040_s5, 3 }
  0x16   : > { %1163 = vmatpush3.msra.mxu0 %v214_v2  ;;  %v311_v3 = vsub.f32 %v172_v0, %v214_v2  ;;  %s158_s28 = scalar_lea.vmem %s1735_s0, %s1117_s25 }
  0x17   : > { %1184 = vmatprep.subr.mxu0 %v1363_v1  ;;  %v169_v6 = vld [vmem:[%s158_s28] sm:$0xff]  ;;  %v170_v7 = vld [vmem:[%s158_s28 + $0x8] sm:$0xff]  ;;  %v171_v8 = vld [vmem:[%s158_s28 + $0x10] sm:$0xff] }
  0x18   : > { %v312_v4 = vand.u32 4294901760, %v311_v3  ;;  %v175_v10 = vsel %vm173_vm1, %v169_v6, 0  ;;  %v178_v11 = vsel %vm173_vm1, %v170_v7, 0  ;;  %v181_v12 = vsel %vm173_vm1, %v171_v8, 0 }
  0x19   : > { %v249_v13 = vand.u32 4294901760, %v175_v10  ;;  %v259_v14 = vand.u32 4294901760, %v178_v11  ;;  %v269_v15 = vand.u32 4294901760, %v181_v12 }
  0x1a   : > { %v313_v5 = vsub.f32 %v311_v3, %v312_v4 }
  0x1b   : > { %v250_v16 = vsub.f32 %v175_v10, %v249_v13  ;;  %v260_v17 = vsub.f32 %v178_v11, %v259_v14  ;;  %v270_v18 = vsub.f32 %v181_v12, %v269_v15 }
  0x1c   : > { %v314_v9 = vand.u32 4294901760, %v313_v5 }
  0x1d   : > { %v251_v19 = vand.u32 4294901760, %v250_v16  ;;  %v261_v20 = vand.u32 4294901760, %v260_v17  ;;  %v271_v23 = vand.u32 4294901760, %v270_v18 }
  0x1e   : > { %1174 = vmatpush3.msra.mxu1 %v314_v9 }
  0x1f   : > { %1176 = vmatmul.mubr.f32.vlgmr.msra.gmra.mxu1 %v249_v13  ;;  %1195 = vmatprep.subr.mxu1 %v1363_v1  ;;  %v252_v21 = vsub.f32 %v250_v16, %v251_v19  ;;  %v262_v22 = vsub.f32 %v260_v17, %v261_v20  ;;  %v272_v26 = vsub.f32 %v270_v18, %v271_v23 }
  0x20   : > { %1196 = vmatpush3.msra.mxu1 %v214_v2  ;;  %1178 = vmatprep.mubr.msk.f32.mxu1 %vm1364_vm0, %v1363_v1 }
  0x21   : > { %1217 = vmatprep.subr.mxu1 %v1363_v1  ;;  %v253_v24 = vand.u32 4294901760, %v252_v21  ;;  %v263_v25 = vand.u32 4294901760, %v262_v22  ;;  %v273_v27 = vand.u32 4294901760, %v272_v26 }
  0x23   : > { %1179 = vmatmul.mubr.f32.gmra.mxu1 %v259_v14  ;;  %1165 = vmatmul.mubr.f32.vlgmr.msra.gmra.mxu0 %v253_v24 }
  0x24   : > { %1181 = vmatprep.mubr.msk.f32.mxu1 %vm1364_vm0, %v1363_v1  ;;  %1185 = vmatpush3.msra.mxu0 %v311_v3 }
  0x25   : > { %1167 = vmatprep.mubr.msk.f32.mxu0 %vm1364_vm0, %v1363_v1  ;;  %1206 = vmatprep.subr.mxu0 %v1363_v1 }
  0x27   : > { %1182 = vmatmul.mubr.f32.gmra.mxu1 %v269_v15  ;;  %1168 = vmatmul.mubr.f32.gmra.mxu0 %v263_v25 }
  0x28   : > { %1197 = vmatprep.mubr.msk.f32.mxu1 %vm1364_vm0, %v1363_v1  ;;  %1170 = vmatprep.mubr.msk.f32.mxu0 %vm1364_vm0, %v1363_v1 }
  0x2b   : > { %1198 = vmatmul.mubr.f32.vlgmr.msra.gmra.mxu1 %v251_v19  ;;  %1171 = vmatmul.mubr.f32.gmra.mxu0 %v273_v27 }
  0x2c   : > { %1218 = vmatpush3.msra.mxu1 %v214_v2  ;;  %1200 = vmatprep.mubr.msk.f32.mxu1 %vm1364_vm0, %v1363_v1 }
  0x2d   : > { %1186 = vmatprep.mubr.msk.f32.mxu0 %vm1364_vm0, %v1363_v1 }
  0x2f   : > { %1201 = vmatmul.mubr.f32.gmra.mxu1 %v261_v20  ;;  %1187 = vmatmul.mubr.f32.vlgmr.msra.gmra.mxu0 %v250_v16 }
  0x30   : > { %1203 = vmatprep.mubr.msk.f32.mxu1 %vm1364_vm0, %v1363_v1  ;;  %1207 = vmatpush3.msra.mxu0 %v312_v4 }
  0x31   : > { %1189 = vmatprep.mubr.msk.f32.mxu0 %vm1364_vm0, %v1363_v1 }
  0x33   : > { %1204 = vmatmul.mubr.f32.gmra.mxu1 %v271_v23  ;;  %1190 = vmatmul.mubr.f32.gmra.mxu0 %v260_v17 }
  0x34   : > { %1219 = vmatprep.mubr.msk.f32.mxu1 %vm1364_vm0, %v1363_v1  ;;  %1192 = vmatprep.mubr.msk.f32.mxu0 %vm1364_vm0, %v1363_v1 }
  0x37   : > { %1220 = vmatmul.mubr.f32.vlgmr.msra.gmra.mxu1 %v249_v13  ;;  %1193 = vmatmul.mubr.f32.gmra.mxu0 %v270_v18 }
  0x38   : > { %1222 = vmatprep.mubr.msk.f32.mxu1 %vm1364_vm0, %v1363_v1  ;;  %1208 = vmatprep.mubr.msk.f32.mxu0 %vm1364_vm0, %v1363_v1 }
  0x3b   : > { %1223 = vmatmul.mubr.f32.gmra.mxu1 %v259_v14  ;;  %1209 = vmatmul.mubr.f32.vlgmr.msra.gmra.mxu0 %v249_v13 }
  0x3c   : > { %1225 = vmatprep.mubr.msk.f32.mxu1 %vm1364_vm0, %v1363_v1  ;;  %1211 = vmatprep.mubr.msk.f32.mxu0 %vm1364_vm0, %v1363_v1 }
  0x3f   : > { %1226 = vmatmul.mubr.f32.gmra.mxu1 %v269_v15  ;;  %1212 = vmatmul.mubr.f32.gmra.mxu0 %v259_v14 }
  0x40   : > { %1214 = vmatprep.mubr.msk.f32.mxu0 %vm1364_vm0, %v1363_v1 }
  0x43   : > { %1215 = vmatmul.mubr.f32.gmra.mxu0 %v269_v15 }
  0xdf   : > { %v351_v28 = vpop.f32.mrf.mxu1 }
  0xe1   : > { %v1177_v29 = vpop.f32.mrf.mxu1 }
  0xe3   : > { %v357_v30 = vpop.f32.mrf.mxu1  ;;  %v255_v32 = vpop.f32.mrf.mxu0 }
  0xe4   : > { %v352_v50 = vadd.f32 %v351_v28, %v255_v32 }
  0xe5   : > { %v1180_v31 = vpop.f32.mrf.mxu1  ;;  %v1166_v34 = vpop.f32.mrf.mxu0 }
  0xe7   : > { %v363_v33 = vpop.f32.mrf.mxu1  ;;  %v265_v36 = vpop.f32.mrf.mxu0 }
  0xe8   : > { %v358_v56 = vadd.f32 %v357_v30, %v265_v36 }
  0xe9   : > { %v1183_v35 = vpop.f32.mrf.mxu1  ;;  %v1169_v38 = vpop.f32.mrf.mxu0 }
  0xea   : > { %v1365_v35 = vmov 683565275  }
  0xeb   : > { %v525_v37 = vpop.f32.mrf.mxu1  ;;  %v275_v40 = vpop.f32.mrf.mxu0 }
  0xec   : > { %v364_v63 = vadd.f32 %v363_v33, %v275_v40  ;;  %v1367_v40 = vmov 2131351028  }
  0xed   : > { %v1199_v39 = vpop.f32.mrf.mxu1  ;;  %v1172_v42 = vpop.f32.mrf.mxu0 }
  0xee   : > { %v1368_v42 = vmov 2102212464  }
  0xef   : > { %v533_v41 = vpop.f32.mrf.mxu1  ;;  %v437_v44 = vpop.f32.mrf.mxu0 }
  0xf0   : > { %v438_v53 = vadd.f32 %v437_v44, %v352_v50  ;;  %v1369_v44 = vmov 920167782  }
  0xf1   : > { %v1202_v43 = vpop.f32.mrf.mxu1  ;;  %v1188_v46 = vpop.f32.mrf.mxu0 }
  0xf2   : > { %v526_v59 = vadd.f32 %v525_v37, %v438_v53  ;;  %v1366_v37 = vmov 2475754826  }
  0xf3   : > { %v541_v45 = vpop.f32.mrf.mxu1  ;;  %v444_v48 = vpop.f32.mrf.mxu0 }
  0xf4   : > { %v445_v60 = vadd.f32 %v444_v48, %v358_v56 }
  0xf5   : > { %v1205_v47 = vpop.f32.mrf.mxu1  ;;  %v1191_v51 = vpop.f32.mrf.mxu0 }
  0xf6   : > { %v534_v5 = vadd.f32 %v533_v41, %v445_v60  ;;  %v1370_v51 = vmov 1326507024  }
  0xf7   : > { %v699_v49 = vpop.f32.mrf.mxu1  ;;  %v451_v54 = vpop.f32.mrf.mxu0 }
  0xf8   : > { %v452_v3 = vadd.f32 %v451_v54, %v364_v63 }
  0xf9   : > { %v1221_v52 = vpop.f32.mrf.mxu1  ;;  %v1194_v57 = vpop.f32.mrf.mxu0 }
  0xfa   : > { %v542_v11 = vadd.f32 %v541_v45, %v452_v3 }
  0xfb   : > { %v705_v55 = vpop.f32.mrf.mxu1  ;;  %v615_v61 = vpop.f32.mrf.mxu0 }
  0xfc   : > { %v616_v0 = vadd.f32 %v615_v61, %v526_v59 }
  0xfd   : > { %v1224_v58 = vpop.f32.mrf.mxu1  ;;  %v1210_v1 = vpop.f32.mrf.mxu0 }
  0xfe   : > { %v1491_v4 = vadd.f32 %v699_v49, %v616_v0 }
  0xff   : > { %v711_v62 = vpop.f32.mrf.mxu1  ;;  %v621_v6 = vpop.f32.mrf.mxu0 }
 0x100   : > { %v715_v7 = vand.u32 2147483647, %v1491_v4  ;;  %v718_v8 = vand.u32 2139095040, %v1491_v4  ;;  %v622_v9 = vadd.f32 %v621_v6, %v534_v5 }
 0x101   : > { %v1227_v2 = vpop.f32.mrf.mxu1  ;;  %v1213_v10 = vpop.f32.mrf.mxu0 }
 0x102   : > { %v719_v12 = vshrl.u32 %v718_v8, 23  ;;  %v722_v13 = vand.u32 8388607, %v715_v7  ;;  %v1497_v14 = vadd.f32 %v705_v55, %v622_v9 }
 0x103   : > { %v627_v15 = vpop.f32.mrf.mxu0 }
 0x104   : > { %v1118_v16 = vadd.s32 4294967169, %v719_v12  ;;  %v628_v17 = vadd.f32 %v627_v15, %v542_v11  ;;  %v819_v18 = vand.u32 2147483647, %v1497_v14  ;;  %v822_v19 = vand.u32 2139095040, %v1497_v14 }
 0x105   : > { %v1216_v20 = vpop.f32.mrf.mxu0  ;;  %v723_v23 = vor.u32 8388608, %v722_v13 }
 0x106   : > { %v725_v21 = vadd.s32 1, %v1118_v16  ;;  %v1501_v22 = vadd.f32 %v711_v62, %v628_v17  ;;  %v823_v24 = vshrl.u32 %v822_v19, 23  ;;  %v826_v25 = vand.u32 8388607, %v819_v18 }
 0x107   : > { %v1506_v31 = vshll.u32 %v723_v23, 8 }
 0x108   : > { %vm726_vm2 = vcmp.gt.s32.totalorder %v725_v21, 0  ;;  %v926_v26 = vand.u32 2139095040, %v1501_v22  ;;  %v1122_v28 = vadd.s32 4294967169, %v823_v24  ;;  %v827_v32 = vor.u32 8388608, %v826_v25 }
 0x109   : > { %v727_v27 = vsel %vm726_vm2, %v725_v21, 0 }
 0x10a   : > { %v728_v29 = vshrl.u32 %v727_v27, 5  ;;  %v729_v30 = vand.u32 31, %v727_v27  ;;  %v927_v33 = vshrl.u32 %v926_v26, 23  ;;  %v829_v39 = vadd.s32 1, %v1122_v28 }
 0x10b   : > { %v867_v19 = vshll.u32 %v827_v32, 8 }
 0x10c   : > { %v730_v34 = vsub.s32 32, %v729_v30  ;;  %v732_v36 = vshll.u32 %v1365_v35, %v729_v30  ;;  %v735_v38 = vshll.u32 %v1366_v37, %v729_v30  ;;  %v738_v41 = vshll.u32 %v1367_v40, %v729_v30 }
 0x10d   : > { %v741_v43 = vshll.u32 %v1368_v42, %v729_v30  ;;  %v744_v45 = vshll.u32 %v1369_v44, %v729_v30  ;;  %vm747_vm3 = vcmp.lt.s32.totalorder %v728_v29, 1  ;;  %vm748_vm4 = vcmp.lt.s32.totalorder %v728_v29, 2 }
 0x10e   : > { %v733_v46 = vshrl.u32 %v1366_v37, %v730_v34  ;;  %v736_v47 = vshrl.u32 %v1367_v40, %v730_v34  ;;  %v739_v48 = vshrl.u32 %v1368_v42, %v730_v34  ;;  %v731_v49 = vshrl.u32 %v1365_v35, %v730_v34 }
 0x10f   : > { %v742_v50 = vshrl.u32 %v1369_v44, %v730_v34  ;;  %v745_v52 = vshrl.u32 %v1370_v51, %v730_v34  ;;  %vm749_vm5 = vcmp.lt.s32.totalorder %v728_v29, 3  ;;  %vm830_vm6 = vcmp.gt.s32.totalorder %v829_v39, 0 }
 0x110   : > { %v734_v53 = vor.u32 %v733_v46, %v732_v36  ;;  %v737_v54 = vor.u32 %v736_v47, %v735_v38  ;;  %v740_v55 = vor.u32 %v739_v48, %v738_v41  ;;  %vm750_vm7 = vcmp.lt.s32.totalorder %v728_v29, 4 }
 0x111   : > { %v743_v56 = vor.u32 %v742_v50, %v741_v43  ;;  %v746_v57 = vor.u32 %v745_v52, %v744_v45  ;;  %v831_v58 = vsel %vm830_vm6, %v829_v39, 0  ;;  %v1126_v20 = vadd.s32 4294967169, %v927_v33 }
 0x112   : > { %v751_v59 = vsel %vm747_vm3, %v731_v49, %v734_v53  ;;  %v752_v60 = vsel %vm750_vm7, %v740_v55, 2102212464  ;;  %v755_v61 = vsel %vm747_vm3, %v734_v53, %v737_v54  ;;  %v759_v62 = vsel %vm747_vm3, %v737_v54, %v740_v55 }
 0x113   : > { %v753_v63 = vsel %vm749_vm5, %v737_v54, %v752_v60  ;;  %v756_v0 = vsel %vm750_vm7, %v743_v56, 920167782  ;;  %v760_v1 = vsel %vm750_vm7, %v746_v57, 1326507024  ;;  %v832_v2 = vshrl.u32 %v831_v58, 5 }
 0x114   : > { %v754_v3 = vsel %vm748_vm4, %v751_v59, %v753_v63  ;;  %v757_v5 = vsel %vm749_vm5, %v740_v55, %v756_v0  ;;  %v761_v6 = vsel %vm749_vm5, %v743_v56, %v760_v1  ;;  %v833_v8 = vand.u32 31, %v831_v58 }
 0x115   : > { %v758_v9 = vsel %vm748_vm4, %v755_v61, %v757_v5  ;;  %v762_v10 = vsel %vm748_vm4, %v759_v62, %v761_v6  ;;  %v770_v16 = vmul.u32 %v1506_v31, %v754_v3  ;;  %vm851_vm8 = vcmp.lt.s32.totalorder %v832_v2, 1 }
 0x116   : > { %v1529_v11 = vmul.u32.u64.low %v1506_v31, %v762_v10  ;;  %v1530_v12 = vmul.u32.u64.high %v1506_v31, %v762_v10, %v1529_v11  ;;  %v1533_v13 = vmul.u32.u64.low %v1506_v31, %v758_v9  ;;  %v1534_v15 = vmul.u32.u64.high %v1506_v31, %v758_v9, %v1533_v13 }
 0x117   : > { %v834_v17 = vsub.s32 32, %v833_v8  ;;  %v836_v21 = vshll.u32 %v1365_v35, %v833_v8  ;;  %v839_v23 = vshll.u32 %v1366_v37, %v833_v8  ;;  %v842_v24 = vshll.u32 %v1367_v40, %v833_v8 }
 0x118   : > { %v845_v28 = vshll.u32 %v1368_v42, %v833_v8  ;;  %vm772_vm9 = vc.u32 %v1530_v12, %v1533_v13  ;;  %v773_v29 = vadd.s32 1, %v1534_v15  ;;  %v848_v31 = vshll.u32 %v1369_v44, %v833_v8 }
 0x119   : > { %v837_v25 = vshrl.u32 %v1366_v37, %v834_v17  ;;  %v840_v26 = vshrl.u32 %v1367_v40, %v834_v17  ;;  %v843_v27 = vshrl.u32 %v1368_v42, %v834_v17  ;;  %v846_v30 = vshrl.u32 %v1369_v44, %v834_v17 }
 0x11a   : > { %v849_v36 = vshrl.u32 %v1370_v51, %v834_v17  ;;  %v774_v38 = vsel %vm772_vm9, %v773_v29, %v1534_v15  ;;  %vm852_vm10 = vcmp.lt.s32.totalorder %v832_v2, 2  ;;  %vm854_vm11 = vcmp.lt.s32.totalorder %v832_v2, 4 }
 0x11b   : > { %v838_v32 = vor.u32 %v837_v25, %v836_v21  ;;  %v841_v33 = vor.u32 %v840_v26, %v839_v23  ;;  %v844_v34 = vor.u32 %v843_v27, %v842_v24  ;;  %v847_v39 = vor.u32 %v846_v30, %v845_v28 }
 0x11c   : > { %v775_v41 = vadd.s32 %v774_v38, %v770_v16  ;;  %v835_v43 = vshrl.u32 %v1365_v35, %v834_v17  ;;  %v850_v45 = vor.u32 %v849_v36, %v848_v31  ;;  %vm853_vm12 = vcmp.lt.s32.totalorder %v832_v2, 3 }
 0x11d   : > { %v856_v46 = vsel %vm854_vm11, %v844_v34, 2102212464  ;;  %v859_v47 = vsel %vm851_vm8, %v838_v32, %v841_v33  ;;  %v860_v48 = vsel %vm854_vm11, %v847_v39, 920167782  ;;  %v863_v49 = vsel %vm851_vm8, %v841_v33, %v844_v34 }
 0x11e   : > { %v776_v50 = vadd.s32 536870912, %v775_v41  ;;  %v855_v52 = vsel %vm851_vm8, %v835_v43, %v838_v32  ;;  %v861_v53 = vsel %vm853_vm12, %v844_v34, %v860_v48  ;;  %v864_v54 = vsel %vm854_vm11, %v850_v45, 1326507024 }
 0x11f   : > { %v857_v55 = vsel %vm853_vm12, %v841_v33, %v856_v46  ;;  %v862_v56 = vsel %vm852_vm10, %v859_v47, %v861_v53  ;;  %v865_v57 = vsel %vm853_vm12, %v847_v39, %v864_v54  ;;  %v933_v58 = vadd.s32 1, %v1126_v20 }
 0x120   : > { %v1557_v59 = vshrl.u32 %v776_v50, 30  ;;  %v866_v60 = vsel %vm852_vm10, %v863_v49, %v865_v57  ;;  %v1560_v61 = vmul.u32.u64.low %v867_v19, %v862_v56  ;;  %v1561_v62 = vmul.u32.u64.high %v867_v19, %v862_v56, %v1560_v61 }
 0x121   : > { %v1564_v63 = vmul.u32.u64.low %v867_v19, %v866_v60  ;;  %v1565_v0 = vmul.u32.u64.high %v867_v19, %v866_v60, %v1564_v63  ;;  %vm934_vm13 = vcmp.gt.s32.totalorder %v933_v58, 0  ;;  %v858_v3 = vsel %vm852_vm10, %v855_v52, %v857_v55 }
 0x122   : > { %v778_v1 = vshll.u32 %v1557_v59, 30  ;;  %v935_v5 = vsel %vm934_vm13, %v933_v58, 0  ;;  %v877_v9 = vadd.s32 1, %v1561_v62  ;;  %v874_v10 = vmul.u32 %v867_v19, %v858_v3 }
 0x123   : > { %v937_v6 = vand.u32 31, %v935_v5  ;;  %vm876_vm14 = vc.u32 %v1565_v0, %v1560_v61  ;;  %v923_v17 = vand.u32 2147483647, %v1501_v22  ;;  %v936_v32 = vshrl.u32 %v935_v5, 5 }
 0x124   : > { %v779_v8 = vsub.s32 %v775_v41, %v778_v1  ;;  %v878_v16 = vsel %vm876_vm14, %v877_v9, %v1561_v62  ;;  %v771_v43 = vadd.s32 %v1533_v13, %v1530_v12  ;;  %vm717_vm5 = vcmp.lt.s32.totalorder %v1491_v4, 0 }
 0x125   : > { %v938_v11 = vsub.s32 32, %v937_v6  ;;  %v879_v20 = vadd.s32 %v878_v16, %v874_v10  ;;  %v930_v19 = vand.u32 8388607, %v923_v17  ;;  %v940_v26 = vshll.u32 %v1365_v35, %v937_v6 }
 0x126   : > { %v781_v15 = vsub.s32 0, %v779_v8  ;;  %v943_v28 = vshll.u32 %v1366_v37, %v937_v6  ;;  %v949_v33 = vshll.u32 %v1368_v42, %v937_v6  ;;  %v946_v41 = vshll.u32 %v1367_v40, %v937_v6 }
 0x127   : > { %v880_v23 = vadd.s32 536870912, %v879_v20  ;;  %v941_v2 = vshrl.u32 %v1366_v37, %v938_v11  ;;  %v944_v24 = vshrl.u32 %v1367_v40, %v938_v11  ;;  %v947_v29 = vshrl.u32 %v1368_v42, %v938_v11 }
 0x128   : > { %v1119_v21 = vmin.u32 %v781_v15, %v779_v8  ;;  %v950_v30 = vshrl.u32 %v1369_v44, %v938_v11  ;;  %v953_v34 = vshrl.u32 %v1370_v51, %v938_v11  ;;  %v952_v45 = vshll.u32 %v1369_v44, %v937_v6 }
 0x129   : > { %v1579_v27 = vshrl.u32 %v880_v23, 30  ;;  %v942_v38 = vor.u32 %v941_v2, %v940_v26  ;;  %v945_v39 = vor.u32 %v944_v24, %v943_v28  ;;  %v931_v48 = vor.u32 8388608, %v930_v19 }
 0x12a   : > { %v783_v25 = vclz %v1119_v21  ;;  %v951_v37 = vor.u32 %v950_v30, %v949_v33  ;;  %v948_v49 = vor.u32 %v947_v29, %v946_v41  ;;  %v954_v51 = vor.u32 %v953_v34, %v952_v45 }
 0x12b   : > { %v882_v36 = vshll.u32 %v1579_v27, 30  ;;  %vm955_vm0 = vcmp.lt.s32.totalorder %v936_v32, 1  ;;  %vm957_vm1 = vcmp.lt.s32.totalorder %v936_v32, 3  ;;  %vm958_vm2 = vcmp.lt.s32.totalorder %v936_v32, 4 }
 0x12c   : > { %v1120_v31 = vadd.s32 4294967294, %v783_v25  ;;  %v963_v40 = vsel %vm955_vm0, %v942_v38, %v945_v39  ;;  %v964_v13 = vsel %vm958_vm2, %v951_v37, 920167782  ;;  %vm956_vm3 = vcmp.lt.s32.totalorder %v936_v32, 2 }
 0x12d   : > { %v883_v47 = vsub.s32 %v879_v20, %v882_v36  ;;  %v960_v44 = vsel %vm958_vm2, %v948_v49, 2102212464  ;;  %v965_v56 = vsel %vm957_vm1, %v948_v49, %v964_v13  ;;  %v939_v60 = vshrl.u32 %v1365_v35, %v938_v11 }
 0x12e   : > { %vm1121_vm15 = vcmp.lt.s32.totalorder %v1120_v31, 0  ;;  %v966_v62 = vsel %vm956_vm3, %v963_v40, %v965_v56  ;;  %v967_v1 = vsel %vm955_vm0, %v945_v39, %v948_v49  ;;  %v971_v3 = vshll.u32 %v931_v48, 8 }
 0x12f   : > { %v786_v46 = vsel %vm1121_vm15, 0, %v1120_v31  ;;  %v885_v52 = vsub.s32 0, %v883_v47  ;;  %v959_v6 = vsel %vm955_vm0, %v939_v60, %v942_v38  ;;  %v968_v9 = vsel %vm958_vm2, %v954_v51, 1326507024 }
 0x130   : > { %v787_v42 = vsub.s32 32, %v786_v46  ;;  %v791_v50 = vsub.s32 4294967266, %v786_v46  ;;  %v788_v53 = vshll.u32 %v779_v8, %v786_v46  ;;  %v961_v8 = vsel %vm957_vm1, %v945_v39, %v960_v44 }
 0x131   : > { %v1123_v55 = vmin.u32 %v885_v52, %v883_v47  ;;  %v969_v15 = vsel %vm957_vm1, %v951_v37, %v968_v9  ;;  %v1602_v16 = vmul.u32.u64.low %v971_v3, %v966_v62  ;;  %v1603_v20 = vmul.u32.u64.high %v971_v3, %v966_v62, %v1602_v16 }
 0x132   : > { %v789_v54 = vshrl.u32 %v771_v43, %v787_v42  ;;  %v792_v12 = vadd.s32 127, %v791_v50  ;;  %v970_v21 = vsel %vm956_vm3, %v967_v1, %v969_v15  ;;  %v962_v23 = vsel %vm956_vm3, %v959_v6, %v961_v8 }
 0x133   : > { %v887_v63 = vclz %v1123_v55  ;;  %v1608_v2 = vmul.u32.u64.low %v971_v3, %v970_v21  ;;  %v1609_v24 = vmul.u32.u64.high %v971_v3, %v970_v21, %v1608_v2  ;;  %v875_v26 = vadd.s32 %v1560_v61, %v1565_v0 }
 0x134   : > { %v790_v57 = vor.u32 %v789_v54, %v788_v53  ;;  %v793_v58 = vshll.u32 %v792_v12, 23  ;;  %v981_v30 = vadd.s32 1, %v1603_v20  ;;  %v801_v33 = vsub.s32 4, %v1557_v59 }
 0x135   : > { %v1124_v10 = vadd.s32 4294967294, %v887_v63  ;;  %v978_v34 = vmul.u32 %v971_v3, %v962_v23  ;;  %vm980_vm6 = vc.u32 %v1609_v24, %v1602_v16  ;;  %vm1620_vm7 = vcmp.le.f32.partialorder %v715_v7, 0.7853982 }
 0x136   : > { %v794_v5 = vor.u32 4788187, %v793_v58  ;;  %v797_v11 = vcvt.s32.f32 %v790_v57  ;;  %v982_v39 = vsel %vm980_vm6, %v981_v30, %v1603_v20  ;;  %v802_v7 = vsel %vm717_vm5, %v801_v33, %v1557_v59 }
 0x137   : > { %vm1125_vm4 = vcmp.lt.s32.totalorder %v1124_v10, 0  ;;  %v983_v45 = vadd.s32 %v982_v39, %v978_v34  ;;  %v804_v50 = vsel %vm1620_vm7, 0, %v802_v7  ;;  %vm821_vm8 = vcmp.lt.s32.totalorder %v1497_v14, 0 }
 0x138   : > { %v795_v35 = vand.u32 2147483647, %v794_v5  ;;  %v890_v19 = vsel %vm1125_vm4, 0, %v1124_v10  ;;  %v808_v40 = vadd.s32 3, %v804_v50  ;;  %v905_v59 = vsub.s32 4, %v1579_v27 }
 0x139   : > { %v891_v28 = vsub.s32 32, %v890_v19  ;;  %v895_v29 = vsub.s32 4294967266, %v890_v19  ;;  %v892_v32 = vshll.u32 %v883_v47, %v890_v19  ;;  %v984_v47 = vadd.s32 536870912, %v983_v45 }
 0x13a   : > { %v798_v25 = vmul.f32 %v797_v11, %v795_v35  ;;  %vm1642_vm9 = vcmp.le.f32.partialorder %v819_v18, 0.7853982  ;;  %v809_v56 = vand.u32 3, %v808_v40  ;;  %v906_v58 = vsel %vm821_vm8, %v905_v59, %v1579_v27 }
 0x13b   : > { %v893_v36 = vshrl.u32 %v875_v26, %v891_v28  ;;  %v896_v38 = vadd.s32 127, %v895_v29  ;;  %v1633_v42 = vshrl.u32 %v984_v47, 30  ;;  %v908_v3 = vsel %vm1642_vm9, 0, %v906_v58 }
 0x13c   : > { %v799_v31 = vxor.u32 2147483648, %v798_v25  ;;  %vm814_vm10 = vcmp.eq.s32.totalorder %v809_v56, 2  ;;  %vm811_vm11 = vcmp.eq.s32.totalorder %v809_v56, 0  ;;  %vm810_vm12 = vcmp.lt.s32.totalorder %v809_v56, 2 }
 0x13d   : > { %v894_v43 = vor.u32 %v893_v36, %v892_v32  ;;  %v897_v37 = vshll.u32 %v896_v38, 23  ;;  %v986_v52 = vshll.u32 %v1633_v42, 30  ;;  %vm1027_vm13 = vcmask 392192  }
 0x13e   : > { %v800_v0 = vsel %vm717_vm5, %v799_v31, %v798_v25  ;;  %vm807_vm15 = vweird.f32 %v1491_v4  ;;  %v912_v9 = vadd.s32 3, %v908_v3  ;;  %v979_v20 = vadd.s32 %v1602_v16, %v1609_v24 }
 0x13f   : > { %v803_v41 = vsel %vm1620_vm7, %v1491_v4, %v800_v0  ;;  %v898_v46 = vor.u32 4788187, %v897_v37  ;;  %v901_v49 = vcvt.s32.f32 %v894_v43  ;;  %v987_v54 = vsub.s32 %v983_v45, %v986_v52 }
 0x140   : > { %1289 = vcosq.f32 %v803_v41  ;;  %v913_v25 = vand.u32 3, %v912_v9  ;;  %vm911_vm3 = vweird.f32 %v1497_v14  ;;  %vm925_vm4 = vcmp.lt.s32.totalorder %v1501_v22, 0 }
 0x141   : > { %1291 = vsinq.f32 %v803_v41  ;;  %v899_v48 = vand.u32 2147483647, %v898_v46  ;;  %v989_v55 = vsub.s32 0, %v987_v54  ;;  %v1009_v0 = vsub.s32 4, %v1633_v42 }
 0x142   : > { %vm918_vm0 = vcmp.eq.s32.totalorder %v913_v25, 2  ;;  %vm915_vm1 = vcmp.eq.s32.totalorder %v913_v25, 0  ;;  %vm914_vm2 = vcmp.lt.s32.totalorder %v913_v25, 2  ;;  %vm924_vm5 = vcmp.le.f32.partialorder %v923_v17, 0.7853982 }
 0x143   : > { %v902_v51 = vmul.f32 %v901_v49, %v899_v48  ;;  %v1127_v57 = vmin.u32 %v989_v55, %v987_v54  ;;  %v1010_v43 = vsel %vm925_vm4, %v1009_v0, %v1633_v42 }
 0x145   : > { %v903_v53 = vxor.u32 2147483648, %v902_v51  ;;  %v991_v62 = vclz %v1127_v57 }
 0x147   : > { %v904_v13 = vsel %vm821_vm8, %v903_v53, %v902_v51  ;;  %v1128_v5 = vadd.s32 4294967294, %v991_v62 }
 0x148   : > { %v907_v44 = vsel %vm1642_vm9, %v1497_v14, %v904_v13  ;;  %v1012_v14 = vsel %vm924_vm5, 0, %v1010_v43  ;;  %vm1015_vm9 = vweird.f32 %v1501_v22 }
 0x149   : > { %1293 = vcosq.f32 %v907_v44  ;;  %vm1129_vm14 = vcmp.lt.s32.totalorder %v1128_v5, 0  ;;  %v1016_v37 = vadd.s32 3, %v1012_v14 }
 0x14a   : > { %1295 = vsinq.f32 %v907_v44  ;;  %v994_v10 = vsel %vm1129_vm14, 0, %v1128_v5 }
 0x14b   : > { %v995_v35 = vsub.s32 32, %v994_v10  ;;  %v999_v11 = vsub.s32 4294967266, %v994_v10  ;;  %v996_v21 = vshll.u32 %v987_v54, %v994_v10  ;;  %v1017_v45 = vand.u32 3, %v1016_v37 }
 0x14d   : > { %v1290_v60 = vpop.eup %1289  ;;  %v997_v23 = vshrl.u32 %v979_v20, %v995_v35  ;;  %v1000_v2 = vadd.s32 127, %v999_v11  ;;  %vm1022_vm6 = vcmp.eq.s32.totalorder %v1017_v45, 2  ;;  %vm1019_vm7 = vcmp.eq.s32.totalorder %v1017_v45, 0 }
 0x14e   : > { %v1292_v18 = vpop.eup %1291  ;;  %v815_v63 = vxor.u32 2147483648, %v1290_v60  ;;  %vm1018_vm8 = vcmp.lt.s32.totalorder %v1017_v45, 2 }
 0x14f   : > { %v812_v1 = vxor.u32 2147483648, %v1292_v18  ;;  %v998_v19 = vor.u32 %v997_v23, %v996_v21  ;;  %v1001_v4 = vshll.u32 %v1000_v2, 23 }
 0x150   : > { %v816_v6 = vsel %vm814_vm10, %v815_v63, %v1292_v18 }
 0x151   : > { %v813_v8 = vsel %vm811_vm11, %v1290_v60, %v812_v1  ;;  %v1002_v30 = vor.u32 4788187, %v1001_v4  ;;  %v1005_v33 = vcvt.s32.f32 %v998_v19 }
 0x152   : > { %v817_v27 = vsel %vm810_vm12, %v813_v8, %v816_v6 }
 0x153   : > { %v818_v15 = vsel %vm807_vm15, nan, %v817_v27  ;;  %v1003_v24 = vand.u32 2147483647, %v1002_v30 }
 0x154   : > { %1028 = vst.msk [vmem:[%s1657_s3] sm:$0xff] %vm1027_vm13, %v818_v15 }
 0x155   : > { %v1006_v36 = vmul.f32 %v1005_v33, %v1003_v24 }
 0x156   : > { %v1294_v26 = vpop.eup %1293 }
 0x157   : > { %v1296_v28 = vpop.eup %1295  ;;  %v919_v29 = vxor.u32 2147483648, %v1294_v26  ;;  %v1007_v61 = vxor.u32 2147483648, %v1006_v36 }
 0x158   : > { %v916_v31 = vxor.u32 2147483648, %v1296_v28 }
 0x159   : > { %v920_v16 = vsel %vm918_vm0, %v919_v29, %v1296_v28  ;;  %v1008_v39 = vsel %vm925_vm4, %v1007_v61, %v1006_v36 }
 0x15a   : > { %v917_v34 = vsel %vm915_vm1, %v1294_v26, %v916_v31  ;;  %v1011_v41 = vsel %vm924_vm5, %v1501_v22, %v1008_v39 }
 0x15b   : > { %v921_v32 = vsel %vm914_vm2, %v917_v34, %v920_v16  ;;  %1297 = vcosq.f32 %v1011_v41 }
 0x15c   : > { %v922_v38 = vsel %vm911_vm3, nan, %v921_v32  ;;  %1299 = vsinq.f32 %v1011_v41 }
 0x15d   : > { %1029 = vst.msk [vmem:[%s1657_s3 + $0x8] sm:$0xff] %vm1027_vm13, %v922_v38 }
 0x168   : > { %v1298_v7 = vpop.eup %1297 }
 0x169   : > { %v1300_v46 = vpop.eup %1299  ;;  %v1023_v47 = vxor.u32 2147483648, %v1298_v7 }
 0x16a   : > { %v1020_v48 = vxor.u32 2147483648, %v1300_v46 }
 0x16b   : > { %v1024_v49 = vsel %vm1022_vm6, %v1023_v47, %v1300_v46  ;;  %1038 = sbr.rel (!%p1427_p5) target bundleno = 395 (0x18b), region = 32 }
 0x16c   : > { %v1021_v17 = vsel %vm1019_vm7, %v1298_v7, %v1020_v48 }
 0x16d   : > { %v1025_v50 = vsel %vm1018_vm8, %v1021_v17, %v1024_v49 }
 0x16e   : > { %v1026_v51 = vsel %vm1015_vm9, nan, %v1025_v50 }
 0x16f   : > { %1030 = vst.msk [vmem:[%s1657_s3 + $0x10] sm:$0xff] %vm1027_vm13, %v1026_v51 }
 0x170   : > { %s1749_s5 = smov (!%p1041_p11, %s1040_s5), 3 }
 0x171   : > { %s1680_s6 = sshll.u32 %s1749_s5, 7 }
 0x172   : > { %s1045_s7 = ssub.s32 384, %s1680_s6 }
 0x173   : > { %1046 = vsyncadd %s1675_s4, %s1045_s7  ;;  %p1131_p12 = scmp.ne.s32.totalorder %s1680_s6, 0  ;;  %s1137_s8 = smul.u32 384, %s1410_s13 }
 0x174   : > { %s1051_s14 = sshll.u32 %s1657_s3, 4  ;;  %s1371_s22 = smov [#allocation2]   ;;  %s1692_s14 = int_to_ptr.vmem [resolvable:$true] %s1051_s14 }
 0x175   : > { %s1690_s19 = scalar_lea.hbm %s1737_s2, %s1137_s8  ;;  %s1301_s21 = scalar_lea.vmem %s1692_s14, %s1680_s6 }
 0x176   : > { %p1302_p13 = scmp.ne.s32.totalorder %s1692_s14, %s1301_s21  ;;  %s1305_s23 = sshll.u32 %s1371_s22, 4  ;;  %s1306_s23 = int_to_ptr.vmem [resolvable:$false] %s1305_s23 }
 0x177   : > { %s1307_s13 = scalar_lea.vmem %s1306_s23, 768  ;;  %p1308_p2 = scmp.lt.s32.totalorder %s1692_s14, %s1306_s23 }
 0x178   : > { %p1303_p0 = pnand %p1302_p13, %p1131_p12  ;;  %p1309_p3 = scmp.lt.s32.totalorder %s1307_s13, %s1301_s21 }
 0x17a   : > { %p1304_p1 = pneg %p1303_p0  ;;  %p1310_p4 = por %p1309_p3, %p1308_p2 }
 0x17c   : > { %p1311_p5 = pnand %p1310_p4, %p1304_p1 }
 0x17e   : > { %1314 = shalt.err (!%p1311_p5)
}
 0x17f   : > { %s1315_s24 = scalar_lea.hbm %s1690_s19, %s1680_s6  ;;  %s1319_s27 = scalar_lea.hbm %s1737_s2, 640 }
 0x180   : > { %p1316_p7 = scmp.ne.s32.totalorder %s1690_s19, %s1315_s24  ;;  %p1320_p10 = scmp.lt.s32.totalorder %s1690_s19, %s1737_s2 }
 0x181   : > { %p1321_p11 = scmp.lt.s32.totalorder %s1319_s27, %s1315_s24 }
 0x182   : > { %p1317_p8 = pnand %p1316_p7, %p1131_p12 }
 0x183   : > { %p1322_p13 = por %p1321_p11, %p1320_p10 }
 0x184   : > { %p1318_p9 = pneg %p1317_p8 }
 0x186   : > { %p1323_p0 = pnand %p1322_p13, %p1318_p9 }
 0x188   : > { %1326 = shalt.err (!%p1323_p0)
}
 0x189   : > { %s1372_s30 = smov 128   ;;  %s1373_s3 = smov 8  }
 0x18a   : > { %1057 = dma.vmem_to_hbm [thread:$0]  (%p1131_p12), %s1692_s14, %s1680_s6, %s1690_s19, %s1675_s4, %s1372_s30, %s1372_s30, %s1373_s3  }
 0x18b PF: > { %p1246_p1 = scmp.ge.s32.totalorder %s1361_s12, 2  ;;  %s1066_s5 = sand.u32 1, %s1349_s9  }
 0x18c   : > { %s1067_s7 = scalar_lea.sflag [#allocation3], %s1066_s5 }
 0x18d   : > { %p1243_p2 = pnand %p1246_p1, %p1431_p6 }
 0x18f   : > { %p1244_p3 = pneg %p1243_p2 }
 0x191   : > { %1344 = dma.done.wait (%p1244_p3), %s1067_s7, 384  }
 0x192   : > { %1346 = vsyncadd (%p1244_p3), %s1067_s7, 4294966912  ;;  %p12_p4 = scmp.ge.s32.totalorder %s1414_s15, 4   ;;  %s1744_s9 = smov %s1353_s10 }
 0x193   : > { %s1745_s10 = smov %s1357_s11  ;;  %s1746_s11 = smov %s1425_s18 }
 0x194   : > { %s1747_s12 = smov %s1414_s15  ;;  %14 = sbr.rel (!%p12_p4) target bundleno = 3 (0x3), region = 63 }
 0x199   :  { %1072 = vsyncpa [#allocation3], 1 }
 0x19a   :  { %1074 = vsyncpa [#allocation3 + $0x1], 1 }

</bundles_post_ra>
